<compile_context>
chip_gen: v5e
topology: v5e:2x2
jax: 0.10.0
libtpu: 0.0.40
codegen_flags: <defaults>
</compile_context>

<pallas_src>
import functools

import jax
import jax.numpy as jnp
from jax.experimental import pallas as pl
from jax.experimental.pallas import tpu as pltpu


# Whole array, resident in VMEM, single-buffered (constant operands: weights, biases, 1/cnt).
_RESIDENT = pl.BlockSpec(memory_space=pltpu.MemorySpace.VMEM)


def _round_up(x, m):
    return ((x + m - 1) // m) * m


# -----------------------------------------------------------------------------
# Fused SEGNN kernel (one node tile per grid step)
# -----------------------------------------------------------------------------
def _segnn_kernel(*refs, dattr, num_pre, num_hidden, num_heads, num_graphs, dhid):
    # ---- unpack refs: inputs..., outputs..., scratch ----
    (x_ref, attr_ref, seg_ref, invcnt_ref,
     w_emb_ref, b_emb_ref, w_pre_ref, b_pre_ref) = refs[:8]
    idx = 8
    if num_hidden > 0:
        w_hid_ref, b_hid_ref = refs[idx:idx + 2]
        idx += 2
    else:
        w_hid_ref = b_hid_ref = None
    head_out_w = []
    for _ in range(num_heads):
        head_out_w.append((refs[idx], refs[idx + 1]))
        idx += 2
    out_refs = refs[idx:idx + num_heads]
    acc_ref = refs[idx + num_heads]

    i = pl.program_id(0)

    @pl.when(i == 0)
    def _():
        acc_ref[...] = jnp.zeros_like(acc_ref)

    x = x_ref[...]                          # (TN, Din)   f32 node features
    attr = attr_ref[...]                    # (TN, Dattr) f32 node attributes
    tn = x.shape[0]

    # Hoisted node-attr lane-broadcasts, reused by every bilinear layer in this tile.
    attr_cols = [jnp.broadcast_to(attr[:, j:j + 1], (tn, dhid)) for j in range(dattr)]

    # --- Embedding: O3TensorProduct(input_irreps, hidden_irreps, node_attr_irreps) ---
    xb = x.astype(jnp.bfloat16)
    h = None
    for j in range(dattr):
        t = attr_cols[j] * jnp.dot(xb, w_emb_ref[j], preferred_element_type=jnp.float32)
        h = t if h is None else h + t
    h = h + b_emb_ref[...]

    # TODO(synk): SEGNN._make_layer is abstract in the reference module, so the graph
    # interaction layers (edge_index / edge_attr / additional_message_features) are
    # undefined here and left as the identity.

    # --- Pre-pool MLP: (num_pre - 1) x O3TensorProductSwishGate + 1 x O3TensorProduct ---
    for l in range(num_pre):
        hb = h.astype(jnp.bfloat16)
        hn = None
        for j in range(dattr):
            t = attr_cols[j] * jnp.dot(hb, w_pre_ref[l, j],
                                       preferred_element_type=jnp.float32)
            hn = t if hn is None else hn + t
        h = hn + b_pre_ref[l]
        if l < num_pre - 1:
            h = h * jax.nn.sigmoid(h)        # Swish gate (scalar irreps), kept in f32

    # --- Mean pooling (fused): segment-sum of this tile via one one-hot MXU matmul ---
    seg = seg_ref[...]                                           # (1, TN) int32 graph ids
    gid = jax.lax.broadcasted_iota(jnp.int32, (num_graphs, tn), 0)
    one_hot = (seg == gid).astype(jnp.float32)                   # (G, TN); pad sentinel -> 0
    acc_ref[...] += jnp.dot(one_hot, h, preferred_element_type=jnp.float32)

    # --- Output heads, computed once on the final node tile (pooled is only (G, Dhid)) ---
    @pl.when(i == pl.num_programs(0) - 1)
    def _():
        pooled = acc_ref[...] * invcnt_ref[...]                  # mean pool, (G, Dhid) f32
        for hd in range(num_heads):
            g = pooled
            for l in range(num_hidden):      # SwishGate layers, no node attr => linear+SiLU
                g = jnp.dot(g.astype(jnp.bfloat16), w_hid_ref[hd, l],
                            preferred_element_type=jnp.float32) + b_hid_ref[hd, l]
                g = g * jax.nn.sigmoid(g)
            w_out_ref, b_out_ref = head_out_w[hd]
            out_refs[hd][...] = (jnp.dot(g.astype(jnp.bfloat16), w_out_ref[...],
                                         preferred_element_type=jnp.float32)
                                 + b_out_ref[...]).astype(out_refs[hd].dtype)


# -----------------------------------------------------------------------------
# Parameter construction (deterministic, synthetic; weights stored bf16)
# -----------------------------------------------------------------------------
def _tp_w(key, din, dattr, dout):
    # e3nn-style path normalization 1/sqrt(fan_in), fan_in = din*dattr; stored as
    # (dattr, din, dout) so each layer is sum_j attr[:, j] * (h @ W[j]).
    w = jax.random.normal(key, (dattr, din, dout), jnp.float32) / jnp.sqrt(din * dattr)
    return w.astype(jnp.bfloat16)


def init_segnn_params(key, *, input_dim, hidden_dim, output_dims, node_attr_dim,
                      num_prepool_layers, num_postpool_layers):
    keys = iter(jax.random.split(key, 256))
    nh = num_postpool_layers - 1
    num_heads = len(output_dims)
    params = {
        "w_emb": _tp_w(next(keys), input_dim, node_attr_dim, hidden_dim),
        "b_emb": jnp.zeros((1, hidden_dim), jnp.float32),
        # (num_prepool_layers - 1) SwishGate layers + 1 plain TP, all with node_attr.
        "w_pre": jnp.stack([_tp_w(next(keys), hidden_dim, node_attr_dim, hidden_dim)
                            for _ in range(num_prepool_layers)]),
        "b_pre": jnp.zeros((num_prepool_layers, 1, hidden_dim), jnp.float32),
        # Post-pool hidden (SwishGate, no attr => linear) layers, stacked across heads.
        "w_hid": (jnp.stack([jnp.stack([_tp_w(next(keys), hidden_dim, 1, hidden_dim)[0]
                                        for _ in range(nh)])
                             for _ in range(num_heads)]) if nh > 0 else None),
        "b_hid": (jnp.zeros((num_heads, nh, 1, hidden_dim), jnp.float32) if nh > 0 else None),
        # Final per-head projections (different output widths).
        "w_out": [_tp_w(next(keys), hidden_dim, 1, d)[0] for d in output_dims],
        "b_out": [jnp.zeros((1, d), jnp.float32) for d in output_dims],
    }
    return params


# -----------------------------------------------------------------------------
# SEGNN forward pass (single fused pallas_call)
# -----------------------------------------------------------------------------
def segnn_forward(params, x, edge_index, edge_attr, node_attr, batch,
                  additional_message_features, *, num_graphs, num_graph_layers,
                  node_tile=1024):
    # Graph interaction layers are abstract in the reference module -> identity here.
    del edge_index, edge_attr, additional_message_features, num_graph_layers

    n, din = x.shape
    dattr = node_attr.shape[1]
    dhid = params["w_emb"].shape[-1]
    num_pre = params["w_pre"].shape[0]
    num_hidden = 0 if params["w_hid"] is None else params["w_hid"].shape[1]
    douts = [w.shape[-1] for w in params["w_out"]]
    num_heads = len(douts)

    # Mean-pool normalization from the un-padded batch vector (tiny scalar glue in JAX).
    counts = jnp.zeros((num_graphs,), jnp.float32).at[batch].add(1.0)
    inv_counts = (1.0 / jnp.maximum(counts, 1.0)).reshape(num_graphs, 1)

    # Pad the node axis to a multiple of the tile size; padded rows get sentinel graph id
    # == num_graphs so their one-hot row is all zeros and they contribute nothing.
    assert node_tile % 128 == 0
    tn = min(node_tile, _round_up(n, 8))
    n_pad = _round_up(n, tn)
    if n_pad != n:
        pad = n_pad - n
        x = jnp.pad(x, ((0, pad), (0, 0)))
        node_attr = jnp.pad(node_attr, ((0, pad), (0, 0)))
        batch = jnp.pad(batch, (0, pad), constant_values=num_graphs)
    batch_row = batch.astype(jnp.int32).reshape(1, n_pad)
    num_tiles = n_pad // tn

    kernel = functools.partial(
        _segnn_kernel, dattr=dattr, num_pre=num_pre, num_hidden=num_hidden,
        num_heads=num_heads, num_graphs=num_graphs, dhid=dhid)

    in_specs = [
        pl.BlockSpec((tn, din), lambda i: (i, 0)),        # node features (streamed, pipelined)
        pl.BlockSpec((tn, dattr), lambda i: (i, 0)),      # node attrs (streamed)
        pl.BlockSpec((1, tn), lambda i: (0, i)),          # graph ids, lane-major (streamed)
        _RESIDENT,                                        # 1/count
        _RESIDENT, _RESIDENT, _RESIDENT, _RESIDENT,       # w_emb, b_emb, w_pre, b_pre
    ]
    args = [x, node_attr, batch_row, inv_counts,
            params["w_emb"], params["b_emb"], params["w_pre"], params["b_pre"]]
    if num_hidden > 0:
        in_specs += [_RESIDENT, _RESIDENT]
        args += [params["w_hid"], params["b_hid"]]
    for w_out, b_out in zip(params["w_out"], params["b_out"]):
        in_specs += [_RESIDENT, _RESIDENT]
        args += [w_out, b_out]

    out_shape = tuple(jax.ShapeDtypeStruct((num_graphs, d), jnp.float32) for d in douts)
    out_specs = tuple(pl.BlockSpec((num_graphs, d), lambda i: (0, 0)) for d in douts)

    flops = 2 * n_pad * dhid * (dattr * din + num_pre * dattr * dhid + num_graphs)
    transcendentals = n_pad * dhid * max(num_pre - 1, 0)
    bytes_accessed = (4 * (x.size + node_attr.size + batch_row.size)
                      + 2 * (params["w_emb"].size + params["w_pre"].size)
                      + 4 * num_graphs * sum(douts))

    outs = pl.pallas_call(
        kernel,
        out_shape=out_shape,
        grid_spec=pltpu.PrefetchScalarGridSpec(
            num_scalar_prefetch=0,
            grid=(num_tiles,),
            in_specs=in_specs,
            out_specs=out_specs,
            scratch_shapes=[pltpu.VMEM((num_graphs, dhid), jnp.float32)],
        ),
        compiler_params=pltpu.CompilerParams(
            # "arbitrary": the pooled accumulator (and last-step head writes) carry state
            # across node tiles.  48 MiB scoped VMEM is safe on v5e/v6e/v7x at these sizes;
            # for large Dhid/Dattr on v7x (64 MiB physical) stream w_pre per layer instead.
            dimension_semantics=("arbitrary",),
            vmem_limit_bytes=48 * 1024 * 1024,
        ),
        cost_estimate=pl.CostEstimate(flops=int(flops),
                                      transcendentals=int(transcendentals),
                                      bytes_accessed=int(bytes_accessed)),
    )(*args)
    return list(outs)


# -----------------------------------------------------------------------------
# Demo
# -----------------------------------------------------------------------------
if __name__ == "__main__":
    key = jax.random.PRNGKey(0)
    k_param, k_x, k_attr, k_eattr, k_edis = jax.random.split(key, 5)

    # Small synthetic graph batch: 2 graphs, 8 nodes each.
    num_nodes = 16
    num_graphs = 2
    num_edges = 32
    input_dim = 8          # input_irreps (scalars)
    hidden_dim = 32        # hidden_irreps (scalars) -- use a multiple of 128 for real runs
    node_attr_dim = 4      # node_attr_irreps (scalars)
    edge_attr_dim = 4      # edge_attr_irreps (unused: graph layers are abstract)
    output_dims = [3, 1]   # output_irreps_lst
    num_graph_layers = 2
    num_prepool_layers = 2
    num_postpool_layers = 2

    params = init_segnn_params(
        k_param,
        input_dim=input_dim, hidden_dim=hidden_dim, output_dims=output_dims,
        node_attr_dim=node_attr_dim,
        num_prepool_layers=num_prepool_layers, num_postpool_layers=num_postpool_layers)

    x = jax.random.normal(k_x, (num_nodes, input_dim), jnp.float32)
    node_attr = jax.random.normal(k_attr, (num_nodes, node_attr_dim), jnp.float32)
    edge_index = jnp.stack([jnp.arange(num_edges) % num_nodes,
                            (jnp.arange(num_edges) * 3) % num_nodes]).astype(jnp.int32)
    edge_attr = jax.random.normal(k_eattr, (num_edges, edge_attr_dim), jnp.float32)
    edge_dis = jax.random.normal(k_edis, (num_edges, 1), jnp.float32)
    batch = jnp.repeat(jnp.arange(num_graphs, dtype=jnp.int32), num_nodes // num_graphs)

    fwd = jax.jit(functools.partial(segnn_forward,
                                    num_graphs=num_graphs,
                                    num_graph_layers=num_graph_layers))
    outputs = fwd(params, x, edge_index, edge_attr, node_attr, batch, edge_dis)
    outputs = jax.block_until_ready(outputs)

    assert len(outputs) == len(output_dims)
    for out, d in zip(outputs, output_dims):
        assert out.shape == (num_graphs, d), out.shape
        assert bool(jnp.all(jnp.isfinite(out)))
    print("KERNEL_OK")
</pallas_src>

<mosaic_0001>
module attributes {stable_mosaic.version = 11 : i64} {
  func.func @_segnn_kernel(%arg0: i32, %arg1: memref<16x8xf32, #tpu.memory_space<vmem>>, %arg2: memref<16x4xf32, #tpu.memory_space<vmem>>, %arg3: memref<1x16xi32, #tpu.memory_space<vmem>>, %arg4: memref<2x1xf32, #tpu.memory_space<vmem>>, %arg5: memref<4x8x32xbf16, #tpu.memory_space<vmem>>, %arg6: memref<1x32xf32, #tpu.memory_space<vmem>>, %arg7: memref<2x4x32x32xbf16, #tpu.memory_space<vmem>>, %arg8: memref<2x1x32xf32, #tpu.memory_space<vmem>>, %arg9: memref<2x1x32x32xbf16, #tpu.memory_space<vmem>>, %arg10: memref<2x1x1x32xf32, #tpu.memory_space<vmem>>, %arg11: memref<32x3xbf16, #tpu.memory_space<vmem>>, %arg12: memref<1x3xf32, #tpu.memory_space<vmem>>, %arg13: memref<32x1xbf16, #tpu.memory_space<vmem>>, %arg14: memref<1x1xf32, #tpu.memory_space<vmem>>, %arg15: memref<2x3xf32, #tpu.memory_space<vmem>>, %arg16: memref<2x1xf32, #tpu.memory_space<vmem>>, %arg17: memref<2x32xf32, #tpu.memory_space<vmem>>) attributes {dimension_semantics = [#tpu.dimension_semantics<arbitrary>], iteration_bounds = array<i64: 1>, scalar_prefetch = 0 : i64, scratch_operands = 1 : i64, tpu.core_type = #tpu.core_type<tc>, window_params = [{transform_indices = @transform_0, window_bounds = array<i64: 16, 8>}, {transform_indices = @transform_1, window_bounds = array<i64: 16, 4>}, {transform_indices = @transform_2, window_bounds = array<i64: 1, 16>}, {pipeline_mode = #tpu.pipeline_mode<synchronous>, transform_indices = @transform_3, window_bounds = array<i64: 2, 1>}, {pipeline_mode = #tpu.pipeline_mode<synchronous>, transform_indices = @transform_4, window_bounds = array<i64: 4, 8, 32>}, {pipeline_mode = #tpu.pipeline_mode<synchronous>, transform_indices = @transform_5, window_bounds = array<i64: 1, 32>}, {pipeline_mode = #tpu.pipeline_mode<synchronous>, transform_indices = @transform_6, window_bounds = array<i64: 2, 4, 32, 32>}, {pipeline_mode = #tpu.pipeline_mode<synchronous>, transform_indices = @transform_7, window_bounds = array<i64: 2, 1, 32>}, {pipeline_mode = #tpu.pipeline_mode<synchronous>, transform_indices = @transform_8, window_bounds = array<i64: 2, 1, 32, 32>}, {pipeline_mode = #tpu.pipeline_mode<synchronous>, transform_indices = @transform_9, window_bounds = array<i64: 2, 1, 1, 32>}, {pipeline_mode = #tpu.pipeline_mode<synchronous>, transform_indices = @transform_10, window_bounds = array<i64: 32, 3>}, {pipeline_mode = #tpu.pipeline_mode<synchronous>, transform_indices = @transform_11, window_bounds = array<i64: 1, 3>}, {pipeline_mode = #tpu.pipeline_mode<synchronous>, transform_indices = @transform_12, window_bounds = array<i64: 32, 1>}, {pipeline_mode = #tpu.pipeline_mode<synchronous>, transform_indices = @transform_13, window_bounds = array<i64: 1, 1>}, {pipeline_mode = #tpu.pipeline_mode<synchronous>, transform_indices = @transform_14, window_bounds = array<i64: 2, 3>}, {pipeline_mode = #tpu.pipeline_mode<synchronous>, transform_indices = @transform_15, window_bounds = array<i64: 2, 1>}]} {
    %c0_i32 = arith.constant 0 : i32
    %0 = arith.cmpi eq, %arg0, %c0_i32 : i32
    %1 = arith.extui %0 : i1 to i32
    %c0_i32_0 = arith.constant 0 : i32
    %2 = arith.cmpi ne, %1, %c0_i32_0 : i32
    scf.if %2 {
      %cst_74 = arith.constant 0.000000e+00 : f32
      %107 = vector.broadcast %cst_74 : f32 to vector<2x32xf32>
      %c0_75 = arith.constant 0 : index
      %c0_76 = arith.constant 0 : index
      %108 = vector.load %arg17[%c0_75, %c0_76] : memref<2x32xf32, #tpu.memory_space<vmem>>, vector<2x32xf32>
      tpu.vector_store %arg17[%c0_75, %c0_76], %107 {strides = array<i32>} : memref<2x32xf32, #tpu.memory_space<vmem>>, vector<2x32xf32>,
    } else {
    }
    %c0 = arith.constant 0 : index
    %c0_1 = arith.constant 0 : index
    %3 = vector.load %arg1[%c0, %c0_1] : memref<16x8xf32, #tpu.memory_space<vmem>>, vector<16x8xf32>
    %c0_2 = arith.constant 0 : index
    %c0_3 = arith.constant 0 : index
    %4 = vector.load %arg2[%c0_2, %c0_3] : memref<16x4xf32, #tpu.memory_space<vmem>>, vector<16x4xf32>
    %5 = vector.extract_strided_slice %4 {offsets = [0, 0], sizes = [16, 1], strides = [1, 1]} : vector<16x4xf32> to vector<16x1xf32>
    %6 = vector.shape_cast %5 : vector<16x1xf32> to vector<16x1xf32>
    %7 = vector.broadcast %6 : vector<16x1xf32> to vector<16x32xf32>
    %8 = vector.extract_strided_slice %4 {offsets = [0, 1], sizes = [16, 1], strides = [1, 1]} : vector<16x4xf32> to vector<16x1xf32>
    %9 = vector.shape_cast %8 : vector<16x1xf32> to vector<16x1xf32>
    %10 = vector.broadcast %9 : vector<16x1xf32> to vector<16x32xf32>
    %11 = vector.extract_strided_slice %4 {offsets = [0, 2], sizes = [16, 1], strides = [1, 1]} : vector<16x4xf32> to vector<16x1xf32>
    %12 = vector.shape_cast %11 : vector<16x1xf32> to vector<16x1xf32>
    %13 = vector.broadcast %12 : vector<16x1xf32> to vector<16x32xf32>
    %14 = vector.extract_strided_slice %4 {offsets = [0, 3], sizes = [16, 1], strides = [1, 1]} : vector<16x4xf32> to vector<16x1xf32>
    %15 = vector.shape_cast %14 : vector<16x1xf32> to vector<16x1xf32>
    %16 = vector.broadcast %15 : vector<16x1xf32> to vector<16x32xf32>
    %17 = arith.truncf %3 : vector<16x8xf32> to vector<16x8xbf16>
    %c0_4 = arith.constant 0 : index
    %c0_5 = arith.constant 0 : index
    %c0_6 = arith.constant 0 : index
    %18 = vector.load %arg5[%c0_4, %c0_5, %c0_6] : memref<4x8x32xbf16, #tpu.memory_space<vmem>>, vector<1x8x32xbf16>
    %19 = vector.shape_cast %18 : vector<1x8x32xbf16> to vector<8x32xbf16>
    %cst = arith.constant dense<0.000000e+00> : vector<16x32xf32>
    %20 = tpu.matmul %17, %19, %cst {dimension_numbers = #tpu.dot_dimension_numbers<[1], [0], [0], [1], [0, 0, 1, 1], [], []>} : vector<16x8xbf16>, vector<8x32xbf16>, vector<16x32xf32> -> vector<16x32xf32>
    %21 = arith.mulf %7, %20 : vector<16x32xf32>
    %c1 = arith.constant 1 : index
    %c0_7 = arith.constant 0 : index
    %c0_8 = arith.constant 0 : index
    %22 = vector.load %arg5[%c1, %c0_7, %c0_8] : memref<4x8x32xbf16, #tpu.memory_space<vmem>>, vector<1x8x32xbf16>
    %23 = vector.shape_cast %22 : vector<1x8x32xbf16> to vector<8x32xbf16>
    %cst_9 = arith.constant dense<0.000000e+00> : vector<16x32xf32>
    %24 = tpu.matmul %17, %23, %cst_9 {dimension_numbers = #tpu.dot_dimension_numbers<[1], [0], [0], [1], [0, 0, 1, 1], [], []>} : vector<16x8xbf16>, vector<8x32xbf16>, vector<16x32xf32> -> vector<16x32xf32>
    %25 = arith.mulf %10, %24 : vector<16x32xf32>
    %26 = arith.addf %21, %25 : vector<16x32xf32>
    %c2 = arith.constant 2 : index
    %c0_10 = arith.constant 0 : index
    %c0_11 = arith.constant 0 : index
    %27 = vector.load %arg5[%c2, %c0_10, %c0_11] : memref<4x8x32xbf16, #tpu.memory_space<vmem>>, vector<1x8x32xbf16>
    %28 = vector.shape_cast %27 : vector<1x8x32xbf16> to vector<8x32xbf16>
    %cst_12 = arith.constant dense<0.000000e+00> : vector<16x32xf32>
    %29 = tpu.matmul %17, %28, %cst_12 {dimension_numbers = #tpu.dot_dimension_numbers<[1], [0], [0], [1], [0, 0, 1, 1], [], []>} : vector<16x8xbf16>, vector<8x32xbf16>, vector<16x32xf32> -> vector<16x32xf32>
    %30 = arith.mulf %13, %29 : vector<16x32xf32>
    %31 = arith.addf %26, %30 : vector<16x32xf32>
    %c3 = arith.constant 3 : index
    %c0_13 = arith.constant 0 : index
    %c0_14 = arith.constant 0 : index
    %32 = vector.load %arg5[%c3, %c0_13, %c0_14] : memref<4x8x32xbf16, #tpu.memory_space<vmem>>, vector<1x8x32xbf16>
    %33 = vector.shape_cast %32 : vector<1x8x32xbf16> to vector<8x32xbf16>
    %cst_15 = arith.constant dense<0.000000e+00> : vector<16x32xf32>
    %34 = tpu.matmul %17, %33, %cst_15 {dimension_numbers = #tpu.dot_dimension_numbers<[1], [0], [0], [1], [0, 0, 1, 1], [], []>} : vector<16x8xbf16>, vector<8x32xbf16>, vector<16x32xf32> -> vector<16x32xf32>
    %35 = arith.mulf %16, %34 : vector<16x32xf32>
    %36 = arith.addf %31, %35 : vector<16x32xf32>
    %c0_16 = arith.constant 0 : index
    %c0_17 = arith.constant 0 : index
    %37 = vector.load %arg6[%c0_16, %c0_17] : memref<1x32xf32, #tpu.memory_space<vmem>>, vector<1x32xf32>
    %38 = vector.broadcast %37 : vector<1x32xf32> to vector<16x32xf32>
    %39 = arith.addf %36, %38 : vector<16x32xf32>
    %40 = arith.truncf %39 : vector<16x32xf32> to vector<16x32xbf16>
    %c0_18 = arith.constant 0 : index
    %c0_19 = arith.constant 0 : index
    %c0_20 = arith.constant 0 : index
    %c0_21 = arith.constant 0 : index
    %41 = vector.load %arg7[%c0_18, %c0_19, %c0_20, %c0_21] : memref<2x4x32x32xbf16, #tpu.memory_space<vmem>>, vector<1x1x32x32xbf16>
    %42 = vector.shape_cast %41 : vector<1x1x32x32xbf16> to vector<32x32xbf16>
    %cst_22 = arith.constant dense<0.000000e+00> : vector<16x32xf32>
    %43 = tpu.matmul %40, %42, %cst_22 {dimension_numbers = #tpu.dot_dimension_numbers<[1], [0], [0], [1], [0, 0, 1, 1], [], []>} : vector<16x32xbf16>, vector<32x32xbf16>, vector<16x32xf32> -> vector<16x32xf32>
    %44 = arith.mulf %7, %43 : vector<16x32xf32>
    %c0_23 = arith.constant 0 : index
    %c1_24 = arith.constant 1 : index
    %c0_25 = arith.constant 0 : index
    %c0_26 = arith.constant 0 : index
    %45 = vector.load %arg7[%c0_23, %c1_24, %c0_25, %c0_26] : memref<2x4x32x32xbf16, #tpu.memory_space<vmem>>, vector<1x1x32x32xbf16>
    %46 = vector.shape_cast %45 : vector<1x1x32x32xbf16> to vector<32x32xbf16>
    %cst_27 = arith.constant dense<0.000000e+00> : vector<16x32xf32>
    %47 = tpu.matmul %40, %46, %cst_27 {dimension_numbers = #tpu.dot_dimension_numbers<[1], [0], [0], [1], [0, 0, 1, 1], [], []>} : vector<16x32xbf16>, vector<32x32xbf16>, vector<16x32xf32> -> vector<16x32xf32>
    %48 = arith.mulf %10, %47 : vector<16x32xf32>
    %49 = arith.addf %44, %48 : vector<16x32xf32>
    %c0_28 = arith.constant 0 : index
    %c2_29 = arith.constant 2 : index
    %c0_30 = arith.constant 0 : index
    %c0_31 = arith.constant 0 : index
    %50 = vector.load %arg7[%c0_28, %c2_29, %c0_30, %c0_31] : memref<2x4x32x32xbf16, #tpu.memory_space<vmem>>, vector<1x1x32x32xbf16>
    %51 = vector.shape_cast %50 : vector<1x1x32x32xbf16> to vector<32x32xbf16>
    %cst_32 = arith.constant dense<0.000000e+00> : vector<16x32xf32>
    %52 = tpu.matmul %40, %51, %cst_32 {dimension_numbers = #tpu.dot_dimension_numbers<[1], [0], [0], [1], [0, 0, 1, 1], [], []>} : vector<16x32xbf16>, vector<32x32xbf16>, vector<16x32xf32> -> vector<16x32xf32>
    %53 = arith.mulf %13, %52 : vector<16x32xf32>
    %54 = arith.addf %49, %53 : vector<16x32xf32>
    %c0_33 = arith.constant 0 : index
    %c3_34 = arith.constant 3 : index
    %c0_35 = arith.constant 0 : index
    %c0_36 = arith.constant 0 : index
    %55 = vector.load %arg7[%c0_33, %c3_34, %c0_35, %c0_36] : memref<2x4x32x32xbf16, #tpu.memory_space<vmem>>, vector<1x1x32x32xbf16>
    %56 = vector.shape_cast %55 : vector<1x1x32x32xbf16> to vector<32x32xbf16>
    %cst_37 = arith.constant dense<0.000000e+00> : vector<16x32xf32>
    %57 = tpu.matmul %40, %56, %cst_37 {dimension_numbers = #tpu.dot_dimension_numbers<[1], [0], [0], [1], [0, 0, 1, 1], [], []>} : vector<16x32xbf16>, vector<32x32xbf16>, vector<16x32xf32> -> vector<16x32xf32>
    %58 = arith.mulf %16, %57 : vector<16x32xf32>
    %59 = arith.addf %54, %58 : vector<16x32xf32>
    %c0_38 = arith.constant 0 : index
    %c0_39 = arith.constant 0 : index
    %c0_40 = arith.constant 0 : index
    %60 = vector.load %arg8[%c0_38, %c0_39, %c0_40] : memref<2x1x32xf32, #tpu.memory_space<vmem>>, vector<1x1x32xf32>
    %61 = vector.shape_cast %60 : vector<1x1x32xf32> to vector<1x32xf32>
    %62 = vector.broadcast %61 : vector<1x32xf32> to vector<16x32xf32>
    %63 = arith.addf %59, %62 : vector<16x32xf32>
    %64 = arith.negf %63 : vector<16x32xf32>
    %65 = math.exp %64 : vector<16x32xf32>
    %cst_41 = arith.constant 1.000000e+00 : f32
    %66 = vector.broadcast %cst_41 : f32 to vector<16x32xf32>
    %67 = arith.addf %66, %65 : vector<16x32xf32>
    %68 = arith.divf %66, %67 : vector<16x32xf32>
    %69 = arith.mulf %63, %68 : vector<16x32xf32>
    %70 = arith.truncf %69 : vector<16x32xf32> to vector<16x32xbf16>
    %c1_42 = arith.constant 1 : index
    %c0_43 = arith.constant 0 : index
    %c0_44 = arith.constant 0 : index
    %c0_45 = arith.constant 0 : index
    %71 = vector.load %arg7[%c1_42, %c0_43, %c0_44, %c0_45] : memref<2x4x32x32xbf16, #tpu.memory_space<vmem>>, vector<1x1x32x32xbf16>
    %72 = vector.shape_cast %71 : vector<1x1x32x32xbf16> to vector<32x32xbf16>
    %cst_46 = arith.constant dense<0.000000e+00> : vector<16x32xf32>
    %73 = tpu.matmul %70, %72, %cst_46 {dimension_numbers = #tpu.dot_dimension_numbers<[1], [0], [0], [1], [0, 0, 1, 1], [], []>} : vector<16x32xbf16>, vector<32x32xbf16>, vector<16x32xf32> -> vector<16x32xf32>
    %74 = arith.mulf %7, %73 : vector<16x32xf32>
    %c1_47 = arith.constant 1 : index
    %c1_48 = arith.constant 1 : index
    %c0_49 = arith.constant 0 : index
    %c0_50 = arith.constant 0 : index
    %75 = vector.load %arg7[%c1_47, %c1_48, %c0_49, %c0_50] : memref<2x4x32x32xbf16, #tpu.memory_space<vmem>>, vector<1x1x32x32xbf16>
    %76 = vector.shape_cast %75 : vector<1x1x32x32xbf16> to vector<32x32xbf16>
    %cst_51 = arith.constant dense<0.000000e+00> : vector<16x32xf32>
    %77 = tpu.matmul %70, %76, %cst_51 {dimension_numbers = #tpu.dot_dimension_numbers<[1], [0], [0], [1], [0, 0, 1, 1], [], []>} : vector<16x32xbf16>, vector<32x32xbf16>, vector<16x32xf32> -> vector<16x32xf32>
    %78 = arith.mulf %10, %77 : vector<16x32xf32>
    %79 = arith.addf %74, %78 : vector<16x32xf32>
    %c1_52 = arith.constant 1 : index
    %c2_53 = arith.constant 2 : index
    %c0_54 = arith.constant 0 : index
    %c0_55 = arith.constant 0 : index
    %80 = vector.load %arg7[%c1_52, %c2_53, %c0_54, %c0_55] : memref<2x4x32x32xbf16, #tpu.memory_space<vmem>>, vector<1x1x32x32xbf16>
    %81 = vector.shape_cast %80 : vector<1x1x32x32xbf16> to vector<32x32xbf16>
    %cst_56 = arith.constant dense<0.000000e+00> : vector<16x32xf32>
    %82 = tpu.matmul %70, %81, %cst_56 {dimension_numbers = #tpu.dot_dimension_numbers<[1], [0], [0], [1], [0, 0, 1, 1], [], []>} : vector<16x32xbf16>, vector<32x32xbf16>, vector<16x32xf32> -> vector<16x32xf32>
    %83 = arith.mulf %13, %82 : vector<16x32xf32>
    %84 = arith.addf %79, %83 : vector<16x32xf32>
    %c1_57 = arith.constant 1 : index
    %c3_58 = arith.constant 3 : index
    %c0_59 = arith.constant 0 : index
    %c0_60 = arith.constant 0 : index
    %85 = vector.load %arg7[%c1_57, %c3_58, %c0_59, %c0_60] : memref<2x4x32x32xbf16, #tpu.memory_space<vmem>>, vector<1x1x32x32xbf16>
    %86 = vector.shape_cast %85 : vector<1x1x32x32xbf16> to vector<32x32xbf16>
    %cst_61 = arith.constant dense<0.000000e+00> : vector<16x32xf32>
    %87 = tpu.matmul %70, %86, %cst_61 {dimension_numbers = #tpu.dot_dimension_numbers<[1], [0], [0], [1], [0, 0, 1, 1], [], []>} : vector<16x32xbf16>, vector<32x32xbf16>, vector<16x32xf32> -> vector<16x32xf32>
    %88 = arith.mulf %16, %87 : vector<16x32xf32>
    %89 = arith.addf %84, %88 : vector<16x32xf32>
    %c1_62 = arith.constant 1 : index
    %c0_63 = arith.constant 0 : index
    %c0_64 = arith.constant 0 : index
    %90 = vector.load %arg8[%c1_62, %c0_63, %c0_64] : memref<2x1x32xf32, #tpu.memory_space<vmem>>, vector<1x1x32xf32>
    %91 = vector.shape_cast %90 : vector<1x1x32xf32> to vector<1x32xf32>
    %92 = vector.broadcast %91 : vector<1x32xf32> to vector<16x32xf32>
    %93 = arith.addf %89, %92 : vector<16x32xf32>
    %c0_65 = arith.constant 0 : index
    %c0_66 = arith.constant 0 : index
    %94 = vector.load %arg3[%c0_65, %c0_66] : memref<1x16xi32, #tpu.memory_space<vmem>>, vector<1x16xi32>
    %95 = tpu.iota {dimensions = array<i32: 0>} : vector<2x16xi32>
    %96 = vector.broadcast %94 : vector<1x16xi32> to vector<2x16xi32>
    %97 = arith.cmpi eq, %96, %95 : vector<2x16xi32>
    %98 = arith.extui %97 : vector<2x16xi1> to vector<2x16xi32>
    %99 = arith.sitofp %98 : vector<2x16xi32> to vector<2x16xf32>
    %c0_67 = arith.constant 0 : index
    %c0_68 = arith.constant 0 : index
    %100 = vector.load %arg17[%c0_67, %c0_68] : memref<2x32xf32, #tpu.memory_space<vmem>>, vector<2x32xf32>
    %cst_69 = arith.constant dense<0.000000e+00> : vector<2x32xf32>
    %101 = tpu.matmul %99, %93, %cst_69 {dimension_numbers = #tpu.dot_dimension_numbers<[1], [0], [0], [1], [0, 0, 1, 1], [], []>} : vector<2x16xf32>, vector<16x32xf32>, vector<2x32xf32> -> vector<2x32xf32>
    %102 = arith.addf %100, %101 : vector<2x32xf32>
    %c0_70 = arith.constant 0 : index
    %c0_71 = arith.constant 0 : index
    %103 = vector.load %arg17[%c0_70, %c0_71] : memref<2x32xf32, #tpu.memory_space<vmem>>, vector<2x32xf32>
    tpu.vector_store %arg17[%c0_70, %c0_71], %102 {strides = array<i32>} : memref<2x32xf32, #tpu.memory_space<vmem>>, vector<2x32xf32>,
    %c0_i32_72 = arith.constant 0 : i32
    %104 = arith.cmpi eq, %arg0, %c0_i32_72 : i32
    %105 = arith.extui %104 : i1 to i32
    %c0_i32_73 = arith.constant 0 : i32
    %106 = arith.cmpi ne, %105, %c0_i32_73 : i32
    scf.if %106 {
      %c0_74 = arith.constant 0 : index
      %c0_75 = arith.constant 0 : index
      %107 = vector.load %arg17[%c0_74, %c0_75] : memref<2x32xf32, #tpu.memory_space<vmem>>, vector<2x32xf32>
      %c0_76 = arith.constant 0 : index
      %c0_77 = arith.constant 0 : index
      %108 = vector.load %arg4[%c0_76, %c0_77] : memref<2x1xf32, #tpu.memory_space<vmem>>, vector<2x1xf32>
      %109 = vector.broadcast %108 : vector<2x1xf32> to vector<2x32xf32>
      %110 = arith.mulf %107, %109 : vector<2x32xf32>
      %111 = arith.truncf %110 : vector<2x32xf32> to vector<2x32xbf16>
      %c0_78 = arith.constant 0 : index
      %c0_79 = arith.constant 0 : index
      %c0_80 = arith.constant 0 : index
      %c0_81 = arith.constant 0 : index
      %112 = vector.load %arg9[%c0_78, %c0_79, %c0_80, %c0_81] : memref<2x1x32x32xbf16, #tpu.memory_space<vmem>>, vector<1x1x32x32xbf16>
      %113 = vector.shape_cast %112 : vector<1x1x32x32xbf16> to vector<32x32xbf16>
      %cst_82 = arith.constant dense<0.000000e+00> : vector<2x32xf32>
      %114 = tpu.matmul %111, %113, %cst_82 {dimension_numbers = #tpu.dot_dimension_numbers<[1], [0], [0], [1], [0, 0, 1, 1], [], []>} : vector<2x32xbf16>, vector<32x32xbf16>, vector<2x32xf32> -> vector<2x32xf32>
      %c0_83 = arith.constant 0 : index
      %c0_84 = arith.constant 0 : index
      %c0_85 = arith.constant 0 : index
      %c0_86 = arith.constant 0 : index
      %115 = vector.load %arg10[%c0_83, %c0_84, %c0_85, %c0_86] : memref<2x1x1x32xf32, #tpu.memory_space<vmem>>, vector<1x1x1x32xf32>
      %116 = vector.shape_cast %115 : vector<1x1x1x32xf32> to vector<1x32xf32>
      %117 = vector.broadcast %116 : vector<1x32xf32> to vector<2x32xf32>
      %118 = arith.addf %114, %117 : vector<2x32xf32>
      %119 = arith.negf %118 : vector<2x32xf32>
      %120 = math.exp %119 : vector<2x32xf32>
      %cst_87 = arith.constant 1.000000e+00 : f32
      %121 = vector.broadcast %cst_87 : f32 to vector<2x32xf32>
      %122 = arith.addf %121, %120 : vector<2x32xf32>
      %123 = arith.divf %121, %122 : vector<2x32xf32>
      %124 = arith.mulf %118, %123 : vector<2x32xf32>
      %125 = arith.truncf %124 : vector<2x32xf32> to vector<2x32xbf16>
      %c0_88 = arith.constant 0 : index
      %c0_89 = arith.constant 0 : index
      %126 = vector.load %arg11[%c0_88, %c0_89] : memref<32x3xbf16, #tpu.memory_space<vmem>>, vector<32x3xbf16>
      %cst_90 = arith.constant dense<0.000000e+00> : vector<2x3xf32>
      %127 = tpu.matmul %125, %126, %cst_90 {dimension_numbers = #tpu.dot_dimension_numbers<[1], [0], [0], [1], [0, 0, 1, 1], [], []>} : vector<2x32xbf16>, vector<32x3xbf16>, vector<2x3xf32> -> vector<2x3xf32>
      %c0_91 = arith.constant 0 : index
      %c0_92 = arith.constant 0 : index
      %128 = vector.load %arg12[%c0_91, %c0_92] : memref<1x3xf32, #tpu.memory_space<vmem>>, vector<1x3xf32>
      %129 = vector.broadcast %128 : vector<1x3xf32> to vector<2x3xf32>
      %130 = arith.addf %127, %129 : vector<2x3xf32>
      %c0_93 = arith.constant 0 : index
      %c0_94 = arith.constant 0 : index
      %131 = vector.load %arg15[%c0_93, %c0_94] : memref<2x3xf32, #tpu.memory_space<vmem>>, vector<2x3xf32>
      tpu.vector_store %arg15[%c0_93, %c0_94], %130 {strides = array<i32>} : memref<2x3xf32, #tpu.memory_space<vmem>>, vector<2x3xf32>,
      %132 = arith.truncf %110 : vector<2x32xf32> to vector<2x32xbf16>
      %c1_95 = arith.constant 1 : index
      %c0_96 = arith.constant 0 : index
      %c0_97 = arith.constant 0 : index
      %c0_98 = arith.constant 0 : index
      %133 = vector.load %arg9[%c1_95, %c0_96, %c0_97, %c0_98] : memref<2x1x32x32xbf16, #tpu.memory_space<vmem>>, vector<1x1x32x32xbf16>
      %134 = vector.shape_cast %133 : vector<1x1x32x32xbf16> to vector<32x32xbf16>
      %cst_99 = arith.constant dense<0.000000e+00> : vector<2x32xf32>
      %135 = tpu.matmul %132, %134, %cst_99 {dimension_numbers = #tpu.dot_dimension_numbers<[1], [0], [0], [1], [0, 0, 1, 1], [], []>} : vector<2x32xbf16>, vector<32x32xbf16>, vector<2x32xf32> -> vector<2x32xf32>
      %c1_100 = arith.constant 1 : index
      %c0_101 = arith.constant 0 : index
      %c0_102 = arith.constant 0 : index
      %c0_103 = arith.constant 0 : index
      %136 = vector.load %arg10[%c1_100, %c0_101, %c0_102, %c0_103] : memref<2x1x1x32xf32, #tpu.memory_space<vmem>>, vector<1x1x1x32xf32>
      %137 = vector.shape_cast %136 : vector<1x1x1x32xf32> to vector<1x32xf32>
      %138 = vector.broadcast %137 : vector<1x32xf32> to vector<2x32xf32>
      %139 = arith.addf %135, %138 : vector<2x32xf32>
      %140 = arith.negf %139 : vector<2x32xf32>
      %141 = math.exp %140 : vector<2x32xf32>
      %cst_104 = arith.constant 1.000000e+00 : f32
      %142 = vector.broadcast %cst_104 : f32 to vector<2x32xf32>
      %143 = arith.addf %142, %141 : vector<2x32xf32>
      %144 = arith.divf %142, %143 : vector<2x32xf32>
      %145 = arith.mulf %139, %144 : vector<2x32xf32>
      %146 = arith.truncf %145 : vector<2x32xf32> to vector<2x32xbf16>
      %c0_105 = arith.constant 0 : index
      %c0_106 = arith.constant 0 : index
      %147 = vector.load %arg13[%c0_105, %c0_106] : memref<32x1xbf16, #tpu.memory_space<vmem>>, vector<32x1xbf16>
      %cst_107 = arith.constant dense<0.000000e+00> : vector<2x1xf32>
      %148 = tpu.matmul %146, %147, %cst_107 {dimension_numbers = #tpu.dot_dimension_numbers<[1], [0], [0], [1], [0, 0, 1, 1], [], []>} : vector<2x32xbf16>, vector<32x1xbf16>, vector<2x1xf32> -> vector<2x1xf32>
      %c0_108 = arith.constant 0 : index
      %c0_109 = arith.constant 0 : index
      %149 = vector.load %arg14[%c0_108, %c0_109] : memref<1x1xf32, #tpu.memory_space<vmem>>, vector<1x1xf32>
      %150 = vector.broadcast %149 : vector<1x1xf32> to vector<2x1xf32>
      %151 = arith.addf %148, %150 : vector<2x1xf32>
      %c0_110 = arith.constant 0 : index
      %c0_111 = arith.constant 0 : index
      %152 = vector.load %arg16[%c0_110, %c0_111] : memref<2x1xf32, #tpu.memory_space<vmem>>, vector<2x1xf32>
      tpu.vector_store %arg16[%c0_110, %c0_111], %151 {strides = array<i32>} : memref<2x1xf32, #tpu.memory_space<vmem>>, vector<2x1xf32>,
    } else {
    }
    return
  }
  func.func @transform_0(%arg0: i32) -> (i32, i32) {
    %c0_i32 = arith.constant 0 : i32
    %c0_i32_0 = arith.constant 0 : i32
    return %arg0, %c0_i32 : i32, i32
  }
  func.func @transform_1(%arg0: i32) -> (i32, i32) {
    %c0_i32 = arith.constant 0 : i32
    %c0_i32_0 = arith.constant 0 : i32
    return %arg0, %c0_i32 : i32, i32
  }
  func.func @transform_2(%arg0: i32) -> (i32, i32) {
    %c0_i32 = arith.constant 0 : i32
    %c0_i32_0 = arith.constant 0 : i32
    return %c0_i32, %arg0 : i32, i32
  }
  func.func @transform_3(%arg0: i32) -> (i32, i32) {
    %c0_i32 = arith.constant 0 : i32
    %c0_i32_0 = arith.constant 0 : i32
    %c0_i32_1 = arith.constant 0 : i32
    return %c0_i32, %c0_i32_0 : i32, i32
  }
  func.func @transform_4(%arg0: i32) -> (i32, i32, i32) {
    %c0_i32 = arith.constant 0 : i32
    %c0_i32_0 = arith.constant 0 : i32
    %c0_i32_1 = arith.constant 0 : i32
    %c0_i32_2 = arith.constant 0 : i32
    return %c0_i32, %c0_i32_0, %c0_i32_1 : i32, i32, i32
  }
  func.func @transform_5(%arg0: i32) -> (i32, i32) {
    %c0_i32 = arith.constant 0 : i32
    %c0_i32_0 = arith.constant 0 : i32
    %c0_i32_1 = arith.constant 0 : i32
    return %c0_i32, %c0_i32_0 : i32, i32
  }
  func.func @transform_6(%arg0: i32) -> (i32, i32, i32, i32) {
    %c0_i32 = arith.constant 0 : i32
    %c0_i32_0 = arith.constant 0 : i32
    %c0_i32_1 = arith.constant 0 : i32
    %c0_i32_2 = arith.constant 0 : i32
    %c0_i32_3 = arith.constant 0 : i32
    return %c0_i32, %c0_i32_0, %c0_i32_1, %c0_i32_2 : i32, i32, i32, i32
  }
  func.func @transform_7(%arg0: i32) -> (i32, i32, i32) {
    %c0_i32 = arith.constant 0 : i32
    %c0_i32_0 = arith.constant 0 : i32
    %c0_i32_1 = arith.constant 0 : i32
    %c0_i32_2 = arith.constant 0 : i32
    return %c0_i32, %c0_i32_0, %c0_i32_1 : i32, i32, i32
  }
  func.func @transform_8(%arg0: i32) -> (i32, i32, i32, i32) {
    %c0_i32 = arith.constant 0 : i32
    %c0_i32_0 = arith.constant 0 : i32
    %c0_i32_1 = arith.constant 0 : i32
    %c0_i32_2 = arith.constant 0 : i32
    %c0_i32_3 = arith.constant 0 : i32
    return %c0_i32, %c0_i32_0, %c0_i32_1, %c0_i32_2 : i32, i32, i32, i32
  }
  func.func @transform_9(%arg0: i32) -> (i32, i32, i32, i32) {
    %c0_i32 = arith.constant 0 : i32
    %c0_i32_0 = arith.constant 0 : i32
    %c0_i32_1 = arith.constant 0 : i32
    %c0_i32_2 = arith.constant 0 : i32
    %c0_i32_3 = arith.constant 0 : i32
    return %c0_i32, %c0_i32_0, %c0_i32_1, %c0_i32_2 : i32, i32, i32, i32
  }
  func.func @transform_10(%arg0: i32) -> (i32, i32) {
    %c0_i32 = arith.constant 0 : i32
    %c0_i32_0 = arith.constant 0 : i32
    %c0_i32_1 = arith.constant 0 : i32
    return %c0_i32, %c0_i32_0 : i32, i32
  }
  func.func @transform_11(%arg0: i32) -> (i32, i32) {
    %c0_i32 = arith.constant 0 : i32
    %c0_i32_0 = arith.constant 0 : i32
    %c0_i32_1 = arith.constant 0 : i32
    return %c0_i32, %c0_i32_0 : i32, i32
  }
  func.func @transform_12(%arg0: i32) -> (i32, i32) {
    %c0_i32 = arith.constant 0 : i32
    %c0_i32_0 = arith.constant 0 : i32
    %c0_i32_1 = arith.constant 0 : i32
    return %c0_i32, %c0_i32_0 : i32, i32
  }
  func.func @transform_13(%arg0: i32) -> (i32, i32) {
    %c0_i32 = arith.constant 0 : i32
    %c0_i32_0 = arith.constant 0 : i32
    %c0_i32_1 = arith.constant 0 : i32
    return %c0_i32, %c0_i32_0 : i32, i32
  }
  func.func @transform_14(%arg0: i32) -> (i32, i32) {
    %c0_i32 = arith.constant 0 : i32
    %c0_i32_0 = arith.constant 0 : i32
    %c0_i32_1 = arith.constant 0 : i32
    return %c0_i32, %c0_i32_0 : i32, i32
  }
  func.func @transform_15(%arg0: i32) -> (i32, i32) {
    %c0_i32 = arith.constant 0 : i32
    %c0_i32_0 = arith.constant 0 : i32
    %c0_i32_1 = arith.constant 0 : i32
    return %c0_i32, %c0_i32_0 : i32, i32
  }
}

</mosaic_0001>

<bundles_post_ra>
// kernel: segnn_forward.1
= control target key start
LH: loop header
LB: loop body
LE: loop exit
PB: predicated region body
PF: predicated region fallthrough
CT: control target
= control target key end

     0   :  { %s1282_s0 = inlined_call_operand.vmem [shape: f32[16,8], index: 0, kind: input, shape index: {}]   ;;  %s1283_s1 = inlined_call_operand.vmem [shape: f32[16,4], index: 1, kind: input, shape index: {}]   ;;  %s1284_s2 = inlined_call_operand.vmem [shape: s32[1,16], index: 2, kind: input, shape index: {}]   ;;  %s1285_s3 = inlined_call_operand.vmem [shape: f32[2,1], index: 3, kind: input, shape index: {}]   ;;  %s1286_s4 = inlined_call_operand.vmem [shape: bf16[4,8,32], index: 4, kind: input, shape index: {}]   ;;  %s1287_s5 = inlined_call_operand.vmem [shape: f32[1,32], index: 5, kind: input, shape index: {}]   ;;  %s1288_s6 = inlined_call_operand.hbm [shape: bf16[2,4,32,32], index: 6, kind: input, shape index: {}]   ;;  %s1289_s7 = inlined_call_operand.vmem [shape: f32[2,1,32], index: 7, kind: input, shape index: {}]   ;;  %s1290_s8 = inlined_call_operand.vmem [shape: bf16[2,1,32,32], index: 8, kind: input, shape index: {}]   ;;  %s1291_s9 = inlined_call_operand.vmem [shape: f32[2,1,1,32], index: 9, kind: input, shape index: {}]   ;;  %s1292_s10 = inlined_call_operand.vmem [shape: bf16[32,3], index: 10, kind: input, shape index: {}]   ;;  %s1293_s11 = inlined_call_operand.vmem [shape: f32[1,3], index: 11, kind: input, shape index: {}]   ;;  %s1294_s12 = inlined_call_operand.vmem [shape: bf16[32,1], index: 12, kind: input, shape index: {}]   ;;  %s1295_s13 = inlined_call_operand.<no memory space> [shape: f32[1,1], index: 13, kind: input, shape index: {}]   ;;  %s1296_s14 = inlined_call_operand.hbm [shape: f32[2,3], index: 14, kind: output, shape index: {0}]   ;;  %s1297_s15 = inlined_call_operand.vmem [shape: f32[2,1], index: 15, kind: output, shape index: {1}]  }
   0x1   :  { %v21_v0 = vstv %s1295_s13 }
   0x2   :  { %22 = vst [vmem:[#allocation3] sm:$0x1] %v21_v0 }
   0x3   :  { %23 = vsyncpa [#allocation5], 0 }
   0x4   :  { %24 = vsyncpa [#allocation6], 0  ;;  %s41_s22 = sshll.u32 %s1288_s6, 4  ;;  %s1051_s23 = smov [#allocation4]   ;;  %s42_s22 = int_to_ptr.hbm [resolvable:$true] %s41_s22 }
   0x5   :  { %s43_s24 = sshll.u32 %s1051_s23, 4  ;;  %s1052_s25 = smov 64   ;;  %s44_s24 = int_to_ptr.vmem [resolvable:$true] %s43_s24 }
   0x6   :  { %s1053_s26 = smov 4  }
   0x7   :  { %49 = dma.hbm_to_vmem [thread:$0]  %s42_s22, 2048, %s44_s24, [#allocation5], %s1052_s25, %s1052_s25, %s1053_s26  }
   0x8   :  { %1047 = dma.done.wait [#allocation5], 2048  }
   0x9   :  { %1048 = vsyncadd [#allocation5], 4294965248  ;;  %v1054_v1 = vmov 1   ;;  %v1055_v2 = vmov 0   ;;  %v1056_v3 = vmov 2   ;;  %vm119_vm0 = vcmask 1043456  }
   0xa   :  { %969 = vset.pattern.permute.xlu1 %v1054_v1  ;;  %968 = vset.pattern.permute.xlu0 %v1055_v2  ;;  %v114_v4 = vld [vmem:[%s1286_s4] sm:$0xf]  ;;  %v809_v5 = vld [vmem:[%s1286_s4 + $0x4] sm:$0xf]  ;;  %v811_v6 = vld [vmem:[%s1286_s4 + $0x8] sm:$0xf] }
   0xb   :  { %970 = vset.pattern.permute.xlu2 %v1056_v3  ;;  %v121_v7 = vsel %vm119_vm0, %v114_v4, 0  ;;  %v142_v8 = vsel %vm119_vm0, %v809_v5, 0  ;;  %v165_v9 = vsel %vm119_vm0, %v811_v6, 0  ;;  %v813_v10 = vld [vmem:[%s1286_s4 + $0xc] sm:$0xf]  ;;  %v75_v11 = vld [vmem:[%s1282_s0] sm:$0xff] }
   0xc   :  { %130 = vmatpush.bf16.msra.mxu0 %v121_v7  ;;  %151 = vmatpush.bf16.msra.mxu1 %v142_v8  ;;  %v188_v12 = vsel %vm119_vm0, %v813_v10, 0  ;;  %v76_v13 = vld [vmem:[%s1282_s0 + $0x8] sm:$0xff]  ;;  %vm115_vm1 = vcmask 64512   ;;  %v77_v14 = vld [vmem:[%s1283_s1] sm:$0xff]  ;;  %v1057_v17 = vmov 3   ;;  %v937_v23 = vld [vmem:[#allocation4 + $0x10] sm:$0xff] }
   0xd   :  { %174 = vmatpush.bf16.msra.mxu2 %v165_v9  ;;  %197 = vmatpush.bf16.msra.mxu3 %v188_v12  ;;  %v113_v15 = vpack.c.bf16 %v76_v13, %v75_v11  ;;  %v78_v16 = vld [vmem:[%s1283_s1 + $0x8] sm:$0xff]  ;;  %v938_v19 = vld [vmem:[#allocation4 + $0x18] sm:$0xff]  ;;  %v941_v25 = vld [vmem:[#allocation4 + $0x30] sm:$0xff]  ;;  %vm231_vm2 = vcmask 261120   ;;  %vm73_vm11 = vcmask 254976   ;;  %vm559_vm13 = vcmask 130048  }
   0xe   :  { %90 = vperm.xlu1 %969, %v77_v14   ;;  %81 = vperm.xlu0 %968, %v77_v14   ;;  %v936_v18 = vld [vmem:[#allocation4 + $0x8] sm:$0xff]  ;;  %v942_v21 = vld [vmem:[#allocation4 + $0x38] sm:$0xff]  ;;  %v935_v22 = vld [vmem:[#allocation4] sm:$0xff]  ;;  %s794_s6 = sshll.u32 %s1296_s14, 4  ;;  %s795_s6 = int_to_ptr.hbm [resolvable:$true] %s794_s6 }
   0xf   :  { %808 = vmatmul.msk.bf16.vlgmr.msra.gmra.mxu0 %vm115_vm1, %v113_v15  ;;  %810 = vmatmul.msk.bf16.vlgmr.msra.gmra.mxu1 %vm115_vm1, %v113_v15  ;;  %v940_v20 = vld [vmem:[#allocation4 + $0x28] sm:$0xff]  ;;  %v939_v24 = vld [vmem:[#allocation4 + $0x20] sm:$0xff]  ;;  %v975_v52 = vld [vmem:[%s1287_s5] ss:$0 sm:$0xff] }
  0x10   :  { %812 = vmatmul.msk.bf16.vlgmr.msra.gmra.mxu2 %vm115_vm1, %v113_v15  ;;  %814 = vmatmul.msk.bf16.vlgmr.msra.gmra.mxu3 %vm115_vm1, %v113_v15  ;;  %v976_v8 = vld [vmem:[%s1289_s7] ss:$0 sm:$0xff]  ;;  %v944_v15 = vld [vmem:[#allocation4 + $0x48] sm:$0xff] }
  0x11   :  { %98 = vperm.xlu2 %970, %v77_v14   ;;  %241 = vmatpush.bf16.msrb.mxu0 %v936_v18 }
  0x12   :  { %274 = vmatpush.bf16.msrb.mxu1 %v938_v19  ;;  %309 = vmatpush.bf16.msrb.mxu2 %v940_v20 }
  0x13   :  { %344 = vmatpush.bf16.msrb.mxu3 %v942_v21  ;;  %v950_v21 = vld [vmem:[#allocation4 + $0x78] sm:$0xff] }
  0x15   :  { %242 = vmatpush.bf16.msrb.mxu0 %v935_v22 }
  0x16   :  { %94 = vperm.xlu1 %969, %v78_v16   ;;  %86 = vperm.xlu0 %968, %v78_v16  }
  0x17   :  { %275 = vmatpush.bf16.msrb.mxu1 %v937_v23  ;;  %310 = vmatpush.bf16.msrb.mxu2 %v939_v24  ;;  %v943_v24 = vld [vmem:[#allocation4 + $0x40] sm:$0xff] }
  0x18   :  { %345 = vmatpush.bf16.msrb.mxu3 %v941_v25  ;;  %v945_v25 = vld [vmem:[#allocation4 + $0x50] sm:$0xff] }
  0x19   :  { %102 = vperm.xlu2 %970, %v78_v16   ;;  %429 = vmatpush.bf16.msra.mxu0 %v944_v15  ;;  %v552_v15 = vlaneseq }
  0x1c   :  { %532 = vmatpush.bf16.msra.mxu3 %v950_v21 }
  0x1d   :  { %430 = vmatpush.bf16.msra.mxu0 %v943_v24  ;;  %v977_v24 = vld [vmem:[%s1289_s7 + $0x1] ss:$0 sm:$0xff] }
  0x1e   :  { %971 = vset.pattern.permute.xlu0 %v1057_v17  ;;  %972 = vset.pattern.permute.xlu1 %v1057_v17  ;;  %v948_v17 = vld [vmem:[#allocation4 + $0x68] sm:$0xff] }
  0x1f   :  { %106 = vperm.xlu0 %971, %v77_v14   ;;  %110 = vperm.xlu1 %972, %v78_v16   ;;  %v946_v16 = vld [vmem:[#allocation4 + $0x58] sm:$0xff] }
  0x20   :  { %462 = vmatpush.bf16.msra.mxu1 %v946_v16  ;;  %497 = vmatpush.bf16.msra.mxu2 %v948_v17 }
  0x21   :  { %973 = vset.pattern.permute.xlu2 %v1055_v2 }
  0x24   :  { %463 = vmatpush.bf16.msra.mxu1 %v945_v25 }
  0x27   :  { %974 = vset.pattern.permute.xlu0 %v1055_v2 }
  0x6b   :  { %v1176_v31 = vpop.permute.xlu2 %98 }
  0x73   :  { %v1187_v44 = vpop.permute.xlu2 %102 }
  0x80   :  { %v1170_v26 = vpop.permute.xlu0 %81  ;;  %v1172_v27 = vpop.permute.xlu1 %90 }
  0x88   :  { %v1174_v30 = vpop.permute.xlu0 %86  ;;  %v1178_v32 = vpop.permute.xlu1 %94 }
  0x8c   :  { %v132_v28 = vpop.f32.mrf.mxu0  ;;  %v153_v29 = vpop.f32.mrf.mxu1 }
  0x8d   :  { %v137_v35 = vmul.f32 %v132_v28, %v1170_v26  ;;  %v158_v36 = vmul.f32 %v153_v29, %v1172_v27  ;;  %v947_v28 = vld [vmem:[#allocation4 + $0x60] sm:$0xff] }
  0x8e   :  { %498 = vmatpush.bf16.msra.mxu2 %v947_v28 }
  0x8f   :  { %v160_v41 = vadd.f32 %v158_v36, %v137_v35 }
  0x91   :  { %v1183_v40 = vpop.permute.xlu0 %106  ;;  %v1190_v47 = vpop.permute.xlu1 %110 }
  0x93   :  { %v176_v33 = vpop.f32.mrf.mxu2  ;;  %v199_v34 = vpop.f32.mrf.mxu3 }
  0x94   :  { %v134_v37 = vpop.f32.mrf.mxu0  ;;  %v155_v38 = vpop.f32.mrf.mxu1  ;;  %v181_v39 = vmul.f32 %v176_v33, %v1176_v31  ;;  %v204_v46 = vmul.f32 %v199_v34, %v1183_v40  ;;  %v949_v33 = vld [vmem:[#allocation4 + $0x70] sm:$0xff] }
  0x95   :  { %v138_v42 = vmul.f32 %v134_v37, %v1174_v30  ;;  %v159_v43 = vmul.f32 %v155_v38, %v1178_v32  ;;  %533 = vmatpush.bf16.msra.mxu3 %v949_v33  ;;  %v955_v33 = vld [vmem:[%s1290_s8 + $0x10] sm:$0xff] }
  0x96   :  { %v183_v45 = vadd.f32 %v181_v39, %v160_v41 }
  0x97   :  { %v161_v50 = vadd.f32 %v159_v43, %v138_v42 }
  0x98   :  { %v206_v53 = vadd.f32 %v204_v46, %v183_v45 }
  0x9a   :  { %v212_v57 = vadd.f32 %v975_v52, %v206_v53 }
  0x9b   :  { %v178_v48 = vpop.f32.mrf.mxu2  ;;  %v201_v49 = vpop.f32.mrf.mxu3 }
  0x9c   :  { %v182_v51 = vmul.f32 %v178_v48, %v1187_v44  ;;  %v205_v55 = vmul.f32 %v201_v49, %v1190_v47 }
  0x9e   :  { %v184_v54 = vadd.f32 %v182_v51, %v161_v50 }
  0xa0   :  { %v207_v56 = vadd.f32 %v205_v55, %v184_v54 }
  0xa2   :  { %v213_v58 = vadd.f32 %v975_v52, %v207_v56 }
  0xa4   :  { %v214_v59 = vpack.c.bf16 %v213_v58, %v212_v57 }
  0xa6   :  { %823 = vmatmul.msk.bf16.vlgmr.msrb.gmra.mxu0 %vm231_vm2, %v214_v59  ;;  %832 = vmatmul.msk.bf16.vlgmr.msrb.gmra.mxu1 %vm231_vm2, %v214_v59 }
  0xa7   :  { %841 = vmatmul.msk.bf16.vlgmr.msrb.gmra.mxu2 %vm231_vm2, %v214_v59  ;;  %850 = vmatmul.msk.bf16.vlgmr.msrb.gmra.mxu3 %vm231_vm2, %v214_v59 }
 0x123   :  { %v244_v60 = vpop.f32.mrf.mxu0  ;;  %v277_v61 = vpop.f32.mrf.mxu1 }
 0x124   :  { %v249_v62 = vmul.f32 %v244_v60, %v1170_v26  ;;  %v282_v63 = vmul.f32 %v277_v61, %v1172_v27 }
 0x126   :  { %v284_v2 = vadd.f32 %v282_v63, %v249_v62 }
 0x12a   :  { %v312_v0 = vpop.f32.mrf.mxu2  ;;  %v347_v1 = vpop.f32.mrf.mxu3 }
 0x12b   :  { %v317_v3 = vmul.f32 %v312_v0, %v1176_v31  ;;  %v246_v4 = vpop.f32.mrf.mxu0  ;;  %v279_v5 = vpop.f32.mrf.mxu1  ;;  %v352_v7 = vmul.f32 %v347_v1, %v1183_v40 }
 0x12c   :  { %v250_v10 = vmul.f32 %v246_v4, %v1174_v30  ;;  %v283_v11 = vmul.f32 %v279_v5, %v1178_v32 }
 0x12d   :  { %v319_v6 = vadd.f32 %v317_v3, %v284_v2  ;;  %v1058_v2 = vmov 0.0   ;;  %v590_v3 = vld [vmem:[%s1285_s3] sm:$0x3] }
 0x12e   :  { %v285_v19 = vadd.f32 %v283_v11, %v250_v10  ;;  %74 = vst.msk [vmem:[#allocation2] sm:$0x3] %vm73_vm11, %v1058_v2  ;;  %593 = vperm.xlu2 %973, %v590_v3  }
 0x12f   :  { %v354_v9 = vadd.f32 %v352_v7, %v319_v6 }
 0x131   :  { %v1210_v12 = vadd.f32 %v976_v8, %v354_v9 }
 0x132   :  { %v314_v13 = vpop.f32.mrf.mxu2  ;;  %v349_v14 = vpop.f32.mrf.mxu3 }
 0x133   :  { %v851_v18 = vmul.f32 -1.442695, %v1210_v12  ;;  %v318_v20 = vmul.f32 %v314_v13, %v1187_v44  ;;  %v353_v23 = vmul.f32 %v349_v14, %v1190_v47 }
 0x135   :  { %983 = vpow2.f32 %v851_v18  ;;  %v320_v22 = vadd.f32 %v318_v20, %v285_v19 }
 0x137   :  { %v355_v29 = vadd.f32 %v353_v23, %v320_v22  ;;  %v553_v22 = vshrl.u32 %v552_v15, 7 }
 0x139   :  { %v361_v34 = vadd.f32 %v976_v8, %v355_v29  ;;  %v951_v29 = vld [vmem:[%s1290_s8] sm:$0xff] }
 0x13b   :  { %v984_v35 = vpop.eup %983  ;;  %v852_v36 = vmul.f32 -1.442695, %v361_v34 }
 0x13c   :  { %v368_v37 = vadd.f32 1.0, %v984_v35 }
 0x13d   :  { %985 = vpow2.f32 %v852_v36 }
 0x13e   :  { %987 = vrcp.f32 %v368_v37  ;;  %v381_v50 = vand.u32 2147483648, %v368_v37  ;;  %vm375_vm4 = vweird.f32 %v368_v37  ;;  %v379_v51 = vand.u32 2147483647, %v368_v37 }
 0x140   :  { %v382_v57 = vor.u32 1.1754944e-38, %v381_v50  ;;  %vm380_vm7 = vcmp.eq.f32.partialorder %v379_v51, 8.507059e+37  ;;  %v980_v51 = vld [vmem:[%s1291_s9 + $0x1] ss:$0 sm:$0xff] }
 0x143   :  { %v986_v38 = vpop.eup %985 }
 0x144   :  { %v988_v39 = vpop.eup %987  ;;  %v369_v41 = vadd.f32 1.0, %v986_v38 }
 0x145   :  { %v371_v42 = vmul.f32 %v988_v39, %v368_v37  ;;  %vm376_vm3 = vweird.f32 %v988_v39 }
 0x146   :  { %989 = vrcp.f32 %v369_v41  ;;  %vm377_vm5 = vmor %vm375_vm4, %vm376_vm3  ;;  %v396_v53 = vand.u32 2147483648, %v369_v41  ;;  %v394_v56 = vand.u32 2147483647, %v369_v41  ;;  %vm390_vm8 = vweird.f32 %v369_v41 }
 0x147   :  { %v372_v43 = vsub.f32 1.0, %v371_v42  ;;  %v954_v42 = vld [vmem:[%s1292_s10 + $0x8] sm:$0xff] }
 0x148   :  { %v397_v60 = vor.u32 1.1754944e-38, %v396_v53  ;;  %vm395_vm10 = vcmp.eq.f32.partialorder %v394_v56, 8.507059e+37  ;;  %684 = vmatpush.bf16.msrb.mxu2 %v954_v42 }
 0x149   :  { %v373_v45 = vmul.f32 %v988_v39, %v372_v43  ;;  %v979_v43 = vld [vmem:[%s1291_s9] ss:$0 sm:$0xff] }
 0x14b   :  { %v374_v48 = vadd.f32 %v988_v39, %v373_v45  ;;  %v953_v45 = vld [vmem:[%s1292_s10] sm:$0xff] }
 0x14c   :  { %v990_v46 = vpop.eup %989  ;;  %685 = vmatpush.bf16.msrb.mxu2 %v953_v45 }
 0x14d   :  { %v386_v49 = vmul.f32 %v990_v46, %v369_v41  ;;  %v378_v54 = vsel %vm377_vm5, %v988_v39, %v374_v48  ;;  %vm391_vm6 = vweird.f32 %v990_v46  ;;  %v958_v48 = vld [vmem:[%s1294_s12 + $0x8] sm:$0xff] }
 0x14e   :  { %v383_v59 = vsel %vm380_vm7, %v382_v57, %v378_v54  ;;  %vm392_vm9 = vmor %vm390_vm8, %vm391_vm6  ;;  %vm785_vm7 = vcmask 1024   ;;  %vm691_vm8 = vcmask 17408  }
 0x14f   :  { %v387_v52 = vsub.f32 1.0, %v386_v49  ;;  %v400_v63 = vmul.f32 %v383_v59, %v1210_v12 }
 0x151   :  { %v388_v55 = vmul.f32 %v990_v46, %v387_v52  ;;  %v957_v52 = vld [vmem:[%s1294_s12] sm:$0xff]  ;;  %s1059_s12 = smov [#allocation7]  }
 0x152   :  { %s792_s13 = sshll.u32 %s1059_s12, 4  ;;  %s793_s13 = int_to_ptr.vmem [resolvable:$true] %s792_s13 }
 0x153   :  { %v389_v58 = vadd.f32 %v990_v46, %v388_v55 }
 0x155   :  { %v393_v61 = vsel %vm392_vm9, %v990_v46, %v389_v58 }
 0x156   :  { %v398_v62 = vsel %vm395_vm10, %v397_v60, %v393_v61 }
 0x157   :  { %v401_v0 = vmul.f32 %v398_v62, %v361_v34  ;;  %v558_v34 = vld [vmem:[#allocation2] sm:$0x3] }
 0x159   :  { %v402_v1 = vpack.c.bf16 %v401_v0, %v400_v63 }
 0x15b   :  { %861 = vmatmul.msk.bf16.vlgmr.msra.gmra.mxu0 %vm231_vm2, %v402_v1  ;;  %870 = vmatmul.msk.bf16.vlgmr.msra.gmra.mxu1 %vm231_vm2, %v402_v1 }
 0x15c   :  { %879 = vmatmul.msk.bf16.vlgmr.msra.gmra.mxu2 %vm231_vm2, %v402_v1  ;;  %888 = vmatmul.msk.bf16.vlgmr.msra.gmra.mxu3 %vm231_vm2, %v402_v1 }
 0x188   :  { %v594_v37 = vpop.permute.xlu2 %593 }
 0x1d8   :  { %v432_v4 = vpop.f32.mrf.mxu0  ;;  %v465_v5 = vpop.f32.mrf.mxu1 }
 0x1d9   :  { %v437_v10 = vmul.f32 %v432_v4, %v1170_v26  ;;  %v470_v11 = vmul.f32 %v465_v5, %v1172_v27  ;;  %v978_v26 = vld [vmem:[%s1284_s2] ss:$0 sm:$0xff] }
 0x1da   :  { %vm555_vm12 = vcmp.eq.s32.totalorder %v978_v26, %v553_v22  ;;  %v981_v22 = vld [vmem:[%s1293_s11] ss:$0 sm:$0xff]  ;;  %v982_v26 = vld [vmem:[#allocation3] ss:$0 sm:$0xff] }
 0x1db   :  { %v472_v16 = vadd.f32 %v470_v11, %v437_v10  ;;  %v890_v28 = vsel %vm555_vm12, 1.0, %v1058_v2 }
 0x1df   :  { %v500_v6 = vpop.f32.mrf.mxu2  ;;  %v535_v7 = vpop.f32.mrf.mxu3 }
 0x1e0   :  { %v434_v8 = vpop.f32.mrf.mxu0  ;;  %v467_v9 = vpop.f32.mrf.mxu1  ;;  %v505_v12 = vmul.f32 %v500_v6, %v1176_v31  ;;  %v540_v27 = vmul.f32 %v535_v7, %v1183_v40  ;;  %v952_v40 = vld [vmem:[%s1290_s8 + $0x8] sm:$0xff] }
 0x1e1   :  { %v438_v13 = vmul.f32 %v434_v8, %v1174_v30  ;;  %v471_v14 = vmul.f32 %v467_v9, %v1178_v32  ;;  %627 = vmatpush.bf16.msrb.mxu1 %v952_v40 }
 0x1e2   :  { %v507_v19 = vadd.f32 %v505_v12, %v472_v16 }
 0x1e3   :  { %v473_v20 = vadd.f32 %v471_v14, %v438_v13 }
 0x1e4   :  { %v542_v23 = vadd.f32 %v540_v27, %v507_v19 }
 0x1e5   :  { %628 = vmatpush.bf16.msrb.mxu1 %v951_v29 }
 0x1e7   :  { %v502_v17 = vpop.f32.mrf.mxu2  ;;  %v537_v18 = vpop.f32.mrf.mxu3 }
 0x1e8   :  { %v506_v21 = vmul.f32 %v502_v17, %v1187_v44  ;;  %v541_v30 = vmul.f32 %v537_v18, %v1190_v47  ;;  %v549_v44 = vadd.f32 %v977_v24, %v542_v23  ;;  %v956_v47 = vld [vmem:[%s1290_s8 + $0x18] sm:$0xff] }
 0x1e9   :  { %721 = vmatpush.bf16.msrb.mxu3 %v956_v47 }
 0x1ea   :  { %v508_v31 = vadd.f32 %v506_v21, %v473_v20 }
 0x1ec   :  { %v543_v32 = vadd.f32 %v541_v30, %v508_v31 }
 0x1ed   :  { %722 = vmatpush.bf16.msrb.mxu3 %v955_v33 }
 0x1ee   :  { %v550_v25 = vadd.f32 %v977_v24, %v543_v32 }
 0x1f0   :  { %577 = vmatpush.msrb.mxu0 %v550_v25 }
 0x1f2   :  { %578 = vmatpush.msrb.mxu0 %v549_v44 }
 0x1f3   :  { %891 = vmatmul.msk.f32.vlgmr.msrb.gmra.mxu0 %vm559_vm13, %v890_v28 }
 0x1f4   :  { %778 = vmatpush.bf16.msra.mxu0 %v958_v48 }
 0x1f8   :  { %779 = vmatpush.bf16.msra.mxu0 %v957_v52 }
 0x270   :  { %v580_v35 = vpop.f32.mrf.mxu0 }
 0x271   :  { %v583_v36 = vadd.f32 %v580_v35, %v558_v34 }
 0x273   :  { %585 = vst.msk [vmem:[#allocation2] sm:$0x3] %vm73_vm11, %v583_v36 }
 0x27a   :  { %v589_v38 = vld [vmem:[#allocation2] sm:$0x3] }
 0x27b   :  { %v596_v39 = vmul.f32 %v594_v37, %v589_v38 }
 0x27d   :  { %v597_v41 = vpack.c.bf16 %v596_v39, %v596_v39 }
 0x27f   :  { %900 = vmatmul.msk.bf16.vlgmr.msrb.gmra.mxu1 %vm231_vm2, %v597_v41  ;;  %924 = vmatmul.msk.bf16.vlgmr.msrb.gmra.mxu3 %vm231_vm2, %v597_v41 }
 0x2fc   :  { %v630_v46 = vpop.f32.mrf.mxu1 }
 0x2fd   :  { %v631_v49 = vadd.f32 %v979_v43, %v630_v46 }
 0x2ff   :  { %v901_v50 = vmul.f32 -1.442695, %v631_v49 }
 0x301   :  { %991 = vpow2.f32 %v901_v50 }
 0x302   :  { %v724_v53 = vpop.f32.mrf.mxu3 }
 0x303   :  { %v725_v54 = vadd.f32 %v980_v51, %v724_v53 }
 0x304   :  { %v632_v55 = vpop.f32.mrf.mxu1 }
 0x305   :  { %v925_v56 = vmul.f32 -1.442695, %v725_v54 }
 0x307   :  { %v992_v57 = vpop.eup %991  ;;  %993 = vpow2.f32 %v925_v56 }
 0x308   :  { %v637_v58 = vadd.f32 1.0, %v992_v57 }
 0x30a   :  { %995 = vrcp.f32 %v637_v58  ;;  %v726_v59 = vpop.f32.mrf.mxu3  ;;  %v649_v1 = vand.u32 2147483648, %v637_v58  ;;  %v647_v3 = vand.u32 2147483647, %v637_v58  ;;  %vm643_vm15 = vweird.f32 %v637_v58 }
 0x30c   :  { %v650_v7 = vor.u32 1.1754944e-38, %v649_v1  ;;  %vm648_vm1 = vcmp.eq.f32.partialorder %v647_v3, 8.507059e+37 }
 0x30d   :  { %v994_v60 = vpop.eup %993 }
 0x30e   :  { %v731_v61 = vadd.f32 1.0, %v994_v60 }
 0x310   :  { %v996_v62 = vpop.eup %995  ;;  %997 = vrcp.f32 %v731_v61  ;;  %v743_v11 = vand.u32 2147483648, %v731_v61  ;;  %v741_v14 = vand.u32 2147483647, %v731_v61  ;;  %vm737_vm4 = vweird.f32 %v731_v61 }
 0x311   :  { %v639_v63 = vmul.f32 %v996_v62, %v637_v58  ;;  %vm644_vm14 = vweird.f32 %v996_v62 }
 0x312   :  { %vm645_vm0 = vmor %vm643_vm15, %vm644_vm14  ;;  %v744_v17 = vor.u32 1.1754944e-38, %v743_v11  ;;  %vm742_vm6 = vcmp.eq.f32.partialorder %v741_v14, 8.507059e+37 }
 0x313   :  { %v640_v0 = vsub.f32 1.0, %v639_v63 }
 0x315   :  { %v641_v2 = vmul.f32 %v996_v62, %v640_v0 }
 0x316   :  { %v998_v4 = vpop.eup %997 }
 0x317   :  { %v642_v5 = vadd.f32 %v996_v62, %v641_v2  ;;  %v733_v6 = vmul.f32 %v998_v4, %v731_v61  ;;  %vm738_vm3 = vweird.f32 %v998_v4 }
 0x318   :  { %vm739_vm5 = vmor %vm737_vm4, %vm738_vm3 }
 0x319   :  { %v646_v8 = vsel %vm645_vm0, %v996_v62, %v642_v5  ;;  %v734_v9 = vsub.f32 1.0, %v733_v6 }
 0x31a   :  { %v651_v10 = vsel %vm648_vm1, %v650_v7, %v646_v8 }
 0x31b   :  { %v653_v12 = vmul.f32 %v651_v10, %v631_v49  ;;  %v735_v13 = vmul.f32 %v998_v4, %v734_v9 }
 0x31d   :  { %v654_v15 = vpack.c.bf16 %v653_v12, %v653_v12  ;;  %v736_v16 = vadd.f32 %v998_v4, %v735_v13 }
 0x31f   :  { %v740_v18 = vsel %vm739_vm5, %v998_v4, %v736_v16  ;;  %910 = vmatmul.msk.bf16.vlgmr.msrb.gmra.mxu2 %vm231_vm2, %v654_v15 }
 0x320   :  { %v745_v19 = vsel %vm742_vm6, %v744_v17, %v740_v18 }
 0x321   :  { %v747_v20 = vmul.f32 %v745_v19, %v725_v54 }
 0x323   :  { %v748_v21 = vpack.c.bf16 %v747_v20, %v747_v20 }
 0x325   :  { %934 = vmatmul.msk.bf16.vlgmr.msra.gmra.mxu0 %vm231_vm2, %v748_v21 }
 0x3a2   :  { %v687_v27 = vpop.f32.mrf.mxu2  ;;  %v781_v31 = vpop.f32.mrf.mxu0 }
 0x3a3   :  { %v688_v30 = vadd.f32 %v981_v22, %v687_v27  ;;  %v782_v23 = vadd.f32 %v982_v26, %v781_v31 }
 0x3a5   :  { %786 = vst.msk [vmem:[%s1297_s15] sm:$0x3] %vm785_vm7, %v782_v23 }
 0x3a6   :  { %692 = vst.msk [vmem:[#allocation7] sm:$0x3] %vm691_vm8, %v688_v30 }
 0x3a7   :  { %797 = dma.vmem_to_hbm [thread:$0]  %s793_s13, 32, %s795_s6, [#allocation6]  }
 0x3aa   :  { %v689_v32 = vpop.f32.mrf.mxu2  ;;  %v783_v24 = vpop.f32.mrf.mxu0 }
 0x3ab   :  { %1049 = dma.done.wait [#allocation6], 32  }
 0x3ac   :  { %1050 = vsyncadd [#allocation6], 4294967264 }
 0x3ad   :  { %806 = vsyncpa [#allocation5], 1 }
 0x3ae   :  { %807 = vsyncpa [#allocation6], 1 }

</bundles_post_ra>
